<compile_context>
chip_gen: v7x
topology: tpu7x:2x2x1
jax: 0.10.0
libtpu: 0.0.40
codegen_flags: <defaults>
</compile_context>

<pallas_src>
import functools

import jax
import jax.numpy as jnp
from jax.experimental import pallas as pl
from jax.experimental.pallas import tpu as pltpu

# synthetic "tokenizer" constants
PAD_ID, CLS_ID, SEP_ID, MASK_ID = 0, 1, 2, 3
NUM_SPECIAL = 4


def _round_up(x, m):
    return (x + m - 1) // m * m


# ---------------------------------------------------------------------------
# Kernel 1: FUSED vocab projection + masked-LM cross-entropy (per-row).
#           Never writes the (M, V) logits to HBM; outputs (M_pad, 1) losses.
# ---------------------------------------------------------------------------
def _mlm_ce_kernel(x_ref, w_ref, b_ref, l_ref, o_ref, m_sc, s_sc, t_sc,
                   *, vocab, tm, tn):
    j = pl.program_id(1)                 # V tiles (inner reduction for LSE)
    nj = pl.num_programs(1)

    @pl.when(j == 0)
    def _():
        m_sc[...] = jnp.full_like(m_sc, -1e30)
        s_sc[...] = jnp.zeros_like(s_sc)
        t_sc[...] = jnp.zeros_like(t_sc)

    # MXU: bf16 x bf16 -> f32 logits tile; bias added once per (i, j) tile.
    logits = jnp.dot(x_ref[...], w_ref[...],
                     preferred_element_type=jnp.float32) + b_ref[...]
    col = j * tn + jax.lax.broadcasted_iota(jnp.int32, (tm, tn), 1)
    lmask = jnp.where(col < vocab, logits, -1e30)   # mask padded vocab lanes

    # Online (streaming) log-sum-exp + one-hot target gather.
    m_new = jnp.maximum(m_sc[...], jnp.max(lmask, axis=-1, keepdims=True))
    s_sc[...] = (s_sc[...] * jnp.exp(m_sc[...] - m_new)
                 + jnp.sum(jnp.exp(lmask - m_new), axis=-1, keepdims=True))
    t_sc[...] = t_sc[...] + jnp.sum(
        jnp.where(col == l_ref[...], logits, 0.0), axis=-1, keepdims=True)
    m_sc[...] = m_new

    @pl.when(j == nj - 1)
    def _():
        valid = (l_ref[...] != -100).astype(jnp.float32)
        o_ref[...] = (m_sc[...] + jnp.log(s_sc[...]) - t_sc[...]) * valid


def fused_mlm_losses(h_l, h_r, w, b, lab_l, lab_r):
    """CE(left) + CE(right), ignore_index=-100, mean reduction per side."""
    B, S, H = h_l.shape
    V = w.shape[1]
    M = B * S
    M2 = 2 * M

    # Tile sizes: lane-dense tn (mult of 128), sublane-aligned tm (mult of 8).
    tm = min(512, _round_up(M2, 8))
    tn = min(512, _round_up(V, 128))
    M_pad = _round_up(M2, tm)
    V_pad = _round_up(V, tn)

    # bf16 MXU inputs, f32 accumulation; CE math stays f32 (v5e VPU/EUP has
    # no bf16 path).
    x = jnp.concatenate([h_l.reshape(M, H), h_r.reshape(M, H)],
                        axis=0).astype(jnp.bfloat16)
    x = jnp.pad(x, ((0, M_pad - M2), (0, 0)))
    lab = jnp.concatenate([lab_l.reshape(M), lab_r.reshape(M)],
                          axis=0).astype(jnp.int32)
    lab = jnp.pad(lab, (0, M_pad - M2), constant_values=-100).reshape(M_pad, 1)
    wp = jnp.pad(w.astype(jnp.bfloat16), ((0, 0), (0, V_pad - V)))
    bp = jnp.pad(b.astype(jnp.float32), (0, V_pad - V)).reshape(1, V_pad)

    kernel = functools.partial(_mlm_ce_kernel, vocab=V, tm=tm, tn=tn)
    per_row = pl.pallas_call(
        kernel,
        out_shape=jax.ShapeDtypeStruct((M_pad, 1), jnp.float32),
        grid_spec=pltpu.PrefetchScalarGridSpec(
            num_scalar_prefetch=0,
            grid=(M_pad // tm, V_pad // tn),
            in_specs=[
                pl.BlockSpec((tm, H), lambda i, j: (i, 0)),   # hidden rows
                pl.BlockSpec((H, tn), lambda i, j: (0, j)),   # weight cols
                pl.BlockSpec((1, tn), lambda i, j: (0, j)),   # bias cols
                pl.BlockSpec((tm, 1), lambda i, j: (i, 0)),   # labels
            ],
            out_specs=pl.BlockSpec((tm, 1), lambda i, j: (i, 0)),
            scratch_shapes=[
                pltpu.VMEM((tm, 1), jnp.float32),   # running row max
                pltpu.VMEM((tm, 1), jnp.float32),   # running row sum-exp
                pltpu.VMEM((tm, 1), jnp.float32),   # target logit
            ]),
        # Per-row output => no cross-M-tile state => M axis is "parallel"
        # (megacore on v7x); V axis is the LSE reduction => "arbitrary".
        compiler_params=pltpu.CompilerParams(
            dimension_semantics=("parallel", "arbitrary"),
            vmem_limit_bytes=32 * 1024 * 1024),
    )(x, wp, bp, lab)

    per_row = per_row[:, 0]
    cnt_l = jnp.maximum(jnp.sum((lab_l != -100).astype(jnp.float32)), 1.0)
    cnt_r = jnp.maximum(jnp.sum((lab_r != -100).astype(jnp.float32)), 1.0)
    loss_l = jnp.sum(per_row[:M]) / cnt_l
    loss_r = jnp.sum(per_row[M:M2]) / cnt_r
    return loss_l + loss_r


# ---------------------------------------------------------------------------
# Kernel 2: MTB head — project the 4*B gathered entity-position rows through
#           the vocab weights, similarity = h.h + t.t accumulated over V
#           tiles, BCE-with-logits mean at the last tile.
# ---------------------------------------------------------------------------
def _mtb_head_kernel(rows_ref, w_ref, b_ref, y_ref, v_ref, o_ref, sim_sc,
                     *, bp_rows):
    j = pl.program_id(0)
    nj = pl.num_programs(0)

    @pl.when(j == 0)
    def _():
        sim_sc[...] = jnp.zeros_like(sim_sc)

    # Zero-padded weight/bias columns give zero logits -> zero product, so no
    # vocab-lane masking is needed for the similarity.
    logits = jnp.dot(rows_ref[...], w_ref[...],
                     preferred_element_type=jnp.float32) + b_ref[...]
    lh = logits[0 * bp_rows:1 * bp_rows, :]
    lt = logits[1 * bp_rows:2 * bp_rows, :]
    rh = logits[2 * bp_rows:3 * bp_rows, :]
    rt = logits[3 * bp_rows:4 * bp_rows, :]
    # cat((h, t)) . cat((h, t)) == h.h + t.t
    sim_sc[...] = sim_sc[...] + jnp.sum(lh * rh + lt * rt,
                                        axis=-1, keepdims=True)

    @pl.when(j == nj - 1)
    def _():
        sim = sim_sc[...]
        y = y_ref[...]
        # BCEWithLogitsLoss (stable): max(x,0) - x*y + log(1 + exp(-|x|))
        per = (jnp.maximum(sim, 0.0) - sim * y
               + jnp.log1p(jnp.exp(-jnp.abs(sim)))) * v_ref[...]
        o_ref[...] = (jnp.sum(per, keepdims=True)
                      / jnp.maximum(jnp.sum(v_ref[...]), 1.0))


def mtb_head_loss(rows, w, b, y, valid):
    """rows (4*Bp, H) f32 ordered [lh; lt; rh; rt] (Bp mult of 8, zero-padded),
    w (H, V), b (V,), y (Bp, 1) f32 labels, valid (Bp, 1) f32 row mask."""
    R, H = rows.shape
    Bp = R // 4
    V = w.shape[1]
    tn = min(512, _round_up(V, 128))
    V_pad = _round_up(V, tn)

    rows_b = rows.astype(jnp.bfloat16)
    wp = jnp.pad(w.astype(jnp.bfloat16), ((0, 0), (0, V_pad - V)))
    bp = jnp.pad(b.astype(jnp.float32), (0, V_pad - V)).reshape(1, V_pad)

    kernel = functools.partial(_mtb_head_kernel, bp_rows=Bp)
    out = pl.pallas_call(
        kernel,
        out_shape=jax.ShapeDtypeStruct((1, 1), jnp.float32),
        grid_spec=pltpu.PrefetchScalarGridSpec(
            num_scalar_prefetch=0,
            grid=(V_pad // tn,),
            in_specs=[
                pl.BlockSpec((R, H), lambda j: (0, 0)),    # gathered rows
                pl.BlockSpec((H, tn), lambda j: (0, j)),   # weight cols
                pl.BlockSpec((1, tn), lambda j: (0, j)),   # bias cols
                pl.BlockSpec((Bp, 1), lambda j: (0, 0)),   # BCE labels
                pl.BlockSpec((Bp, 1), lambda j: (0, 0)),   # valid-row mask
            ],
            out_specs=pl.BlockSpec((1, 1), lambda j: (0, 0)),
            scratch_shapes=[pltpu.VMEM((Bp, 1), jnp.float32)]),
        compiler_params=pltpu.CompilerParams(
            dimension_semantics=("arbitrary",),
            vmem_limit_bytes=32 * 1024 * 1024),
    )(rows_b, wp, bp, y, valid)
    return out[0, 0]


# ---------------------------------------------------------------------------
# Plain-JAX glue (masking RNG, embedding gather, orchestration)
# ---------------------------------------------------------------------------
def mask_tokens_jax(key, inputs, not_mask_pos, vocab_size):
    """JAX port of mask_tokens (80% MASK / 10% random / 10% keep)."""
    k1, k2, k3, k4 = jax.random.split(key, 4)
    special = inputs < NUM_SPECIAL            # special tokens + padding
    prob = jnp.where(special, 0.0, 0.15)
    masked = jax.random.bernoulli(k1, prob) & (not_mask_pos == 0)
    labels = jnp.where(masked, inputs, -100)
    replaced = jax.random.bernoulli(k2, 0.8, inputs.shape) & masked
    out = jnp.where(replaced, MASK_ID, inputs)
    randomized = jax.random.bernoulli(k3, 0.5, inputs.shape) & masked & ~replaced
    random_words = jax.random.randint(k4, inputs.shape, 0, vocab_size)
    out = jnp.where(randomized, random_words, out)
    return out, labels


def mtb_forward(params, l_input, l_mask, l_ph, l_pt,
                r_input, r_mask, r_ph, r_pt, label, key):
    B, S = l_input.shape
    V = params["w"].shape[1]
    indice = jnp.arange(B)
    l_nmp = jnp.zeros((B, S), jnp.int32).at[indice, l_ph].set(1).at[indice, l_pt].set(1)
    r_nmp = jnp.zeros((B, S), jnp.int32).at[indice, r_ph].set(1).at[indice, r_pt].set(1)

    kl, kr = jax.random.split(key)
    m_l_input, m_l_labels = mask_tokens_jax(kl, l_input, l_nmp, V)
    m_r_input, m_r_labels = mask_tokens_jax(kr, r_input, r_nmp, V)

    # TODO(synk): stand-in for the BERT encoder: embedding lookup + attention mask.
    h_l = params["emb"][m_l_input] * l_mask[..., None]       # (B, S, H)
    h_r = params["emb"][m_r_input] * r_mask[..., None]

    # MLM losses: one fused projection + CE kernel for BOTH sides;
    # logits never hit HBM.
    m_loss = fused_mlm_losses(h_l, h_r, params["w"], params["b"],
                              m_l_labels, m_r_labels)

    # MTB head: plain-JAX gather of the 4*B entity-position hidden rows
    # (a few hundred KB at most), then one V-tiled Pallas kernel for
    # projection + similarity + BCE.
    Bp = _round_up(B, 8)

    def gather_pad(h, pos):
        return jnp.pad(h[indice, pos], ((0, Bp - B), (0, 0)))

    rows = jnp.concatenate([gather_pad(h_l, l_ph), gather_pad(h_l, l_pt),
                            gather_pad(h_r, r_ph), gather_pad(h_r, r_pt)], axis=0)
    y = jnp.pad(label.astype(jnp.float32), (0, Bp - B)).reshape(Bp, 1)
    valid = (jnp.arange(Bp) < B).astype(jnp.float32).reshape(Bp, 1)
    r_loss = mtb_head_loss(rows, params["w"], params["b"], y, valid)

    return m_loss, r_loss, (h_l, h_r, m_l_labels, m_r_labels)


# ---------------------------------------------------------------------------
# Pure-JAX references for validation (same bf16-in / f32-acc numerics)
# ---------------------------------------------------------------------------
def reference_logits(hidden, w, b):
    return jnp.dot(hidden.astype(jnp.bfloat16), w.astype(jnp.bfloat16),
                   preferred_element_type=jnp.float32) + b


def reference_ce(logits, labels):
    valid = (labels != -100).astype(jnp.float32)
    lse = jax.nn.logsumexp(logits, axis=-1)
    tgt = jnp.take_along_axis(
        logits, jnp.maximum(labels, 0)[..., None], axis=-1)[..., 0]
    per = (lse - tgt) * valid
    return jnp.sum(per) / jnp.maximum(jnp.sum(valid), 1.0)


def reference_r_loss(l_logits, r_logits, l_ph, l_pt, r_ph, r_pt, label):
    B = l_logits.shape[0]
    ind = jnp.arange(B)
    l_state = jnp.concatenate([l_logits[ind, l_ph], l_logits[ind, l_pt]], axis=1)
    r_state = jnp.concatenate([r_logits[ind, r_ph], r_logits[ind, r_pt]], axis=1)
    sim = jnp.sum(l_state * r_state, axis=1)
    y = label.astype(jnp.float32)
    per = jnp.maximum(sim, 0.0) - sim * y + jnp.log1p(jnp.exp(-jnp.abs(sim)))
    return jnp.mean(per)


if __name__ == "__main__":
    B, S, H, V = 2, 16, 32, 128
    key = jax.random.PRNGKey(0)
    k_emb, k_w, k_in, k_mask = jax.random.split(key, 4)

    params = {
        "emb": (jax.random.normal(k_emb, (V, H), jnp.float32) * 0.02),
        "w": (jax.random.normal(k_w, (H, V), jnp.float32) * 0.02),
        "b": jnp.zeros((V,), jnp.float32),
    }

    kk = jax.random.split(k_in, 7)
    l_input = jax.random.randint(kk[0], (B, S), NUM_SPECIAL, V)
    r_input = jax.random.randint(kk[1], (B, S), NUM_SPECIAL, V)
    l_mask = jnp.ones((B, S), jnp.float32)
    r_mask = jnp.ones((B, S), jnp.float32)
    l_ph = jax.random.randint(kk[2], (B,), 1, S)
    l_pt = jax.random.randint(kk[3], (B,), 1, S)
    r_ph = jax.random.randint(kk[4], (B,), 1, S)
    r_pt = jax.random.randint(kk[5], (B,), 1, S)
    label = jax.random.randint(kk[6], (B,), 0, 2)

    m_loss, r_loss, aux = mtb_forward(
        params, l_input, l_mask, l_ph, l_pt,
        r_input, r_mask, r_ph, r_pt, label, k_mask)
    jax.block_until_ready((m_loss, r_loss))

    # validate Pallas kernels against pure-JAX references
    h_l, h_r, m_l_labels, m_r_labels = aux
    lg_l = reference_logits(h_l, params["w"], params["b"])
    lg_r = reference_logits(h_r, params["w"], params["b"])
    m_ref = reference_ce(lg_l, m_l_labels) + reference_ce(lg_r, m_r_labels)
    r_ref = reference_r_loss(lg_l, lg_r, l_ph, l_pt, r_ph, r_pt, label)
    assert jnp.allclose(m_loss, m_ref, rtol=1e-3, atol=1e-5), (m_loss, m_ref)
    assert jnp.allclose(r_loss, r_ref, rtol=1e-3, atol=1e-5), (r_loss, r_ref)

    print("KERNEL_OK")
</pallas_src>

<mosaic_0001>
module attributes {stable_mosaic.version = 11 : i64} {
  func.func @_mlm_ce_kernel(%arg0: i32, %arg1: i32, %arg2: memref<64x32xbf16, #tpu.memory_space<vmem>>, %arg3: memref<32x128xbf16, #tpu.memory_space<vmem>>, %arg4: memref<1x128xf32, #tpu.memory_space<vmem>>, %arg5: memref<64x1xi32, #tpu.memory_space<vmem>>, %arg6: memref<64x1xf32, #tpu.memory_space<vmem>>, %arg7: memref<64x1xf32, #tpu.memory_space<vmem>>, %arg8: memref<64x1xf32, #tpu.memory_space<vmem>>, %arg9: memref<64x1xf32, #tpu.memory_space<vmem>>) attributes {dimension_semantics = [#tpu.dimension_semantics<parallel>, #tpu.dimension_semantics<arbitrary>], iteration_bounds = array<i64: 1, 1>, scalar_prefetch = 0 : i64, scratch_operands = 3 : i64, tpu.core_type = #tpu.core_type<tc>, window_params = [{transform_indices = @transform_0, window_bounds = array<i64: 64, 32>}, {transform_indices = @transform_1, window_bounds = array<i64: 32, 128>}, {transform_indices = @transform_2, window_bounds = array<i64: 1, 128>}, {transform_indices = @transform_3, window_bounds = array<i64: 64, 1>}, {transform_indices = @transform_4, window_bounds = array<i64: 64, 1>}]} {
    %c0_i32 = arith.constant 0 : i32
    %0 = arith.cmpi eq, %arg1, %c0_i32 : i32
    %1 = arith.extui %0 : i1 to i32
    %c0_i32_0 = arith.constant 0 : i32
    %2 = arith.cmpi ne, %1, %c0_i32_0 : i32
    scf.if %2 {
      %cst_30 = arith.constant -1.000000e+30 : f32
      %47 = vector.broadcast %cst_30 : f32 to vector<64x1xf32>
      %c0_31 = arith.constant 0 : index
      %c0_32 = arith.constant 0 : index
      %48 = vector.load %arg7[%c0_31, %c0_32] : memref<64x1xf32, #tpu.memory_space<vmem>>, vector<64x1xf32>
      tpu.vector_store %arg7[%c0_31, %c0_32], %47 {strides = array<i32>} : memref<64x1xf32, #tpu.memory_space<vmem>>, vector<64x1xf32>,
      %cst_33 = arith.constant 0.000000e+00 : f32
      %49 = vector.broadcast %cst_33 : f32 to vector<64x1xf32>
      %c0_34 = arith.constant 0 : index
      %c0_35 = arith.constant 0 : index
      %50 = vector.load %arg8[%c0_34, %c0_35] : memref<64x1xf32, #tpu.memory_space<vmem>>, vector<64x1xf32>
      tpu.vector_store %arg8[%c0_34, %c0_35], %49 {strides = array<i32>} : memref<64x1xf32, #tpu.memory_space<vmem>>, vector<64x1xf32>,
      %cst_36 = arith.constant 0.000000e+00 : f32
      %51 = vector.broadcast %cst_36 : f32 to vector<64x1xf32>
      %c0_37 = arith.constant 0 : index
      %c0_38 = arith.constant 0 : index
      %52 = vector.load %arg9[%c0_37, %c0_38] : memref<64x1xf32, #tpu.memory_space<vmem>>, vector<64x1xf32>
      tpu.vector_store %arg9[%c0_37, %c0_38], %51 {strides = array<i32>} : memref<64x1xf32, #tpu.memory_space<vmem>>, vector<64x1xf32>,
    } else {
    }
    %c0 = arith.constant 0 : index
    %c0_1 = arith.constant 0 : index
    %3 = vector.load %arg2[%c0, %c0_1] : memref<64x32xbf16, #tpu.memory_space<vmem>>, vector<64x32xbf16>
    %c0_2 = arith.constant 0 : index
    %c0_3 = arith.constant 0 : index
    %4 = vector.load %arg3[%c0_2, %c0_3] : memref<32x128xbf16, #tpu.memory_space<vmem>>, vector<32x128xbf16>
    %cst = arith.constant dense<0.000000e+00> : vector<64x128xf32>
    %5 = tpu.matmul %3, %4, %cst {dimension_numbers = #tpu.dot_dimension_numbers<[1], [0], [0], [1], [0, 0, 1, 1], [], []>} : vector<64x32xbf16>, vector<32x128xbf16>, vector<64x128xf32> -> vector<64x128xf32>
    %c0_4 = arith.constant 0 : index
    %c0_5 = arith.constant 0 : index
    %6 = vector.load %arg4[%c0_4, %c0_5] : memref<1x128xf32, #tpu.memory_space<vmem>>, vector<1x128xf32>
    %7 = vector.broadcast %6 : vector<1x128xf32> to vector<64x128xf32>
    %8 = arith.addf %5, %7 : vector<64x128xf32>
    %c128_i32 = arith.constant 128 : i32
    %9 = arith.muli %arg1, %c128_i32 : i32
    %10 = tpu.iota {dimensions = array<i32: 1>} : vector<64x128xi32>
    %11 = vector.broadcast %9 : i32 to vector<64x128xi32>
    %12 = arith.addi %11, %10 : vector<64x128xi32>
    %c128_i32_6 = arith.constant 128 : i32
    %13 = vector.broadcast %c128_i32_6 : i32 to vector<64x128xi32>
    %14 = arith.cmpi slt, %12, %13 : vector<64x128xi32>
    %cst_7 = arith.constant -1.000000e+30 : f32
    %15 = vector.broadcast %cst_7 : f32 to vector<64x128xf32>
    %16 = arith.select %14, %8, %15 : vector<64x128xi1>, vector<64x128xf32>
    %c0_8 = arith.constant 0 : index
    %c0_9 = arith.constant 0 : index
    %17 = vector.load %arg7[%c0_8, %c0_9] : memref<64x1xf32, #tpu.memory_space<vmem>>, vector<64x1xf32>
    %cst_10 = arith.constant dense<0xFF800000> : vector<64xf32>
    %18 = vector.multi_reduction <maximumf>, %16, %cst_10 [1] : vector<64x128xf32> to vector<64xf32>
    %19 = vector.shape_cast %18 : vector<64xf32> to vector<64x1xf32>
    %20 = arith.maximumf %17, %19 : vector<64x1xf32>
    %c0_11 = arith.constant 0 : index
    %c0_12 = arith.constant 0 : index
    %21 = vector.load %arg8[%c0_11, %c0_12] : memref<64x1xf32, #tpu.memory_space<vmem>>, vector<64x1xf32>
    %c0_13 = arith.constant 0 : index
    %c0_14 = arith.constant 0 : index
    %22 = vector.load %arg7[%c0_13, %c0_14] : memref<64x1xf32, #tpu.memory_space<vmem>>, vector<64x1xf32>
    %23 = arith.subf %22, %20 : vector<64x1xf32>
    %24 = math.exp %23 : vector<64x1xf32>
    %25 = arith.mulf %21, %24 : vector<64x1xf32>
    %26 = vector.broadcast %20 : vector<64x1xf32> to vector<64x128xf32>
    %27 = arith.subf %16, %26 : vector<64x128xf32>
    %28 = math.exp %27 : vector<64x128xf32>
    %cst_15 = arith.constant dense<0.000000e+00> : vector<64xf32>
    %29 = vector.multi_reduction <add>, %28, %cst_15 [1] : vector<64x128xf32> to vector<64xf32>
    %30 = vector.shape_cast %29 : vector<64xf32> to vector<64x1xf32>
    %31 = arith.addf %25, %30 : vector<64x1xf32>
    %c0_16 = arith.constant 0 : index
    %c0_17 = arith.constant 0 : index
    %32 = vector.load %arg8[%c0_16, %c0_17] : memref<64x1xf32, #tpu.memory_space<vmem>>, vector<64x1xf32>
    tpu.vector_store %arg8[%c0_16, %c0_17], %31 {strides = array<i32>} : memref<64x1xf32, #tpu.memory_space<vmem>>, vector<64x1xf32>,
    %c0_18 = arith.constant 0 : index
    %c0_19 = arith.constant 0 : index
    %33 = vector.load %arg9[%c0_18, %c0_19] : memref<64x1xf32, #tpu.memory_space<vmem>>, vector<64x1xf32>
    %c0_20 = arith.constant 0 : index
    %c0_21 = arith.constant 0 : index
    %34 = vector.load %arg5[%c0_20, %c0_21] : memref<64x1xi32, #tpu.memory_space<vmem>>, vector<64x1xi32>
    %35 = vector.broadcast %34 : vector<64x1xi32> to vector<64x128xi32>
    %36 = arith.cmpi eq, %12, %35 : vector<64x128xi32>
    %cst_22 = arith.constant 0.000000e+00 : f32
    %37 = vector.broadcast %cst_22 : f32 to vector<64x128xf32>
    %38 = arith.select %36, %8, %37 : vector<64x128xi1>, vector<64x128xf32>
    %cst_23 = arith.constant dense<0.000000e+00> : vector<64xf32>
    %39 = vector.multi_reduction <add>, %38, %cst_23 [1] : vector<64x128xf32> to vector<64xf32>
    %40 = vector.shape_cast %39 : vector<64xf32> to vector<64x1xf32>
    %41 = arith.addf %33, %40 : vector<64x1xf32>
    %c0_24 = arith.constant 0 : index
    %c0_25 = arith.constant 0 : index
    %42 = vector.load %arg9[%c0_24, %c0_25] : memref<64x1xf32, #tpu.memory_space<vmem>>, vector<64x1xf32>
    tpu.vector_store %arg9[%c0_24, %c0_25], %41 {strides = array<i32>} : memref<64x1xf32, #tpu.memory_space<vmem>>, vector<64x1xf32>,
    %c0_26 = arith.constant 0 : index
    %c0_27 = arith.constant 0 : index
    %43 = vector.load %arg7[%c0_26, %c0_27] : memref<64x1xf32, #tpu.memory_space<vmem>>, vector<64x1xf32>
    tpu.vector_store %arg7[%c0_26, %c0_27], %20 {strides = array<i32>} : memref<64x1xf32, #tpu.memory_space<vmem>>, vector<64x1xf32>,
    %c0_i32_28 = arith.constant 0 : i32
    %44 = arith.cmpi eq, %arg1, %c0_i32_28 : i32
    %45 = arith.extui %44 : i1 to i32
    %c0_i32_29 = arith.constant 0 : i32
    %46 = arith.cmpi ne, %45, %c0_i32_29 : i32
    scf.if %46 {
      %c0_30 = arith.constant 0 : index
      %c0_31 = arith.constant 0 : index
      %47 = vector.load %arg5[%c0_30, %c0_31] : memref<64x1xi32, #tpu.memory_space<vmem>>, vector<64x1xi32>
      %c-100_i32 = arith.constant -100 : i32
      %48 = vector.broadcast %c-100_i32 : i32 to vector<64x1xi32>
      %49 = arith.cmpi ne, %47, %48 : vector<64x1xi32>
      %50 = arith.extui %49 : vector<64x1xi1> to vector<64x1xi32>
      %51 = arith.sitofp %50 : vector<64x1xi32> to vector<64x1xf32>
      %c0_32 = arith.constant 0 : index
      %c0_33 = arith.constant 0 : index
      %52 = vector.load %arg7[%c0_32, %c0_33] : memref<64x1xf32, #tpu.memory_space<vmem>>, vector<64x1xf32>
      %c0_34 = arith.constant 0 : index
      %c0_35 = arith.constant 0 : index
      %53 = vector.load %arg8[%c0_34, %c0_35] : memref<64x1xf32, #tpu.memory_space<vmem>>, vector<64x1xf32>
      %54 = math.log %53 : vector<64x1xf32>
      %55 = arith.addf %52, %54 : vector<64x1xf32>
      %c0_36 = arith.constant 0 : index
      %c0_37 = arith.constant 0 : index
      %56 = vector.load %arg9[%c0_36, %c0_37] : memref<64x1xf32, #tpu.memory_space<vmem>>, vector<64x1xf32>
      %57 = arith.subf %55, %56 : vector<64x1xf32>
      %58 = arith.mulf %57, %51 : vector<64x1xf32>
      %c0_38 = arith.constant 0 : index
      %c0_39 = arith.constant 0 : index
      %59 = vector.load %arg6[%c0_38, %c0_39] : memref<64x1xf32, #tpu.memory_space<vmem>>, vector<64x1xf32>
      tpu.vector_store %arg6[%c0_38, %c0_39], %58 {strides = array<i32>} : memref<64x1xf32, #tpu.memory_space<vmem>>, vector<64x1xf32>,
    } else {
    }
    return
  }
  func.func @transform_0(%arg0: i32, %arg1: i32) -> (i32, i32) {
    %c0_i32 = arith.constant 0 : i32
    %c0_i32_0 = arith.constant 0 : i32
    return %arg0, %c0_i32 : i32, i32
  }
  func.func @transform_1(%arg0: i32, %arg1: i32) -> (i32, i32) {
    %c0_i32 = arith.constant 0 : i32
    %c0_i32_0 = arith.constant 0 : i32
    return %c0_i32, %arg1 : i32, i32
  }
  func.func @transform_2(%arg0: i32, %arg1: i32) -> (i32, i32) {
    %c0_i32 = arith.constant 0 : i32
    %c0_i32_0 = arith.constant 0 : i32
    return %c0_i32, %arg1 : i32, i32
  }
  func.func @transform_3(%arg0: i32, %arg1: i32) -> (i32, i32) {
    %c0_i32 = arith.constant 0 : i32
    %c0_i32_0 = arith.constant 0 : i32
    return %arg0, %c0_i32 : i32, i32
  }
  func.func @transform_4(%arg0: i32, %arg1: i32) -> (i32, i32) {
    %c0_i32 = arith.constant 0 : i32
    %c0_i32_0 = arith.constant 0 : i32
    return %arg0, %c0_i32 : i32, i32
  }
}

</mosaic_0001>

<bundles_post_ra>
// kernel: tpu_custom_call.1
= control target key start
LH: loop header
LB: loop body
LE: loop exit
PB: predicated region body
PF: predicated region fallthrough
CT: control target
= control target key end

     0   :  { %vm98_vm0 = vcmask 261120   ;;  %vm22_vm1 = vcmask 7168   ;;  %v666_v6 = vmov -1e+30   ;;  %v667_v24 = vmov 0   ;;  %s1011_s1 = inlined_call_operand.vmem [shape: bf16[32,128], index: 1, kind: input, shape index: {}]   ;;  %s1012_s0 = inlined_call_operand.vmem [shape: bf16[64,32], index: 0, kind: input, shape index: {}]   ;;  %s1013_s2 = inlined_call_operand.vmem [shape: f32[1,128], index: 2, kind: input, shape index: {}]   ;;  %s1014_s3 = inlined_call_operand.vmem [shape: s32[64,1], index: 3, kind: input, shape index: {}]   ;;  %s1015_s4 = inlined_call_operand.vmem [shape: f32[64,1], index: 4, kind: output, shape index: {}]  }
   0x1   :  { %v612_v0 = vld [vmem:[%s1011_s1] sm:$0xff]   ;;  %v613_v1 = vld [vmem:[%s1011_s1 + $0x8] sm:$0xff]   ;;  %v616_v3 = vld [vmem:[%s1012_s0 + $0x10] sm:$0xff]   ;;  %25 = vst.msk [vmem:[#allocation2 + $0x10] sm:$0xff] %vm22_vm1, %v666_v6  ;;  %611 = vset.pattern.permute.xlu1 %v667_v24  ;;  %610 = vset.pattern.permute.xlu0 %v667_v24  ;;  %v668_v25 = vmov 0.0  }
   0x2   :  { %591 = vmatprep.subr.bf16.mxu0 %v612_v0  ;;  %603 = vmatprep.subr.bf16.mxu1 %v612_v0  ;;  %v614_v2 = vld [vmem:[%s1012_s0] sm:$0xff]   ;;  %v615_v4 = vld [vmem:[%s1012_s0 + $0x8] sm:$0xff]   ;;  %v617_v5 = vld [vmem:[%s1012_s0 + $0x18] sm:$0xff]   ;;  %23 = vst.msk [vmem:[#allocation2] sm:$0xff] %vm22_vm1, %v666_v6 }
   0x3   :  { %592 = vmatpush3.bf16.msra.mxu0 %v612_v0  ;;  %605 = vmatpush3.bf16.msra.mxu1 %v612_v0  ;;  %24 = vst.msk [vmem:[#allocation2 + $0x8] sm:$0xff] %vm22_vm1, %v666_v6  ;;  %26 = vst.msk [vmem:[#allocation2 + $0x18] sm:$0xff] %vm22_vm1, %v666_v6  ;;  %v566_v7 = vld [vmem:[%s1013_s2] ss:$0 sm:$0xff]  ;;  %v809_v39 = vld [vmem:[%s1014_s3 + $0x8] sm:$0xff] }
   0x4   :  { %593 = vmatprep.subr.bf16.mxu0 %v613_v1  ;;  %604 = vmatprep.subr.bf16.mxu1 %v613_v1  ;;  %27 = vst.msk [vmem:[#allocation2 + $0x20] sm:$0xff] %vm22_vm1, %v666_v6  ;;  %28 = vst.msk [vmem:[#allocation2 + $0x28] sm:$0xff] %vm22_vm1, %v666_v6  ;;  %v833_v48 = vld [vmem:[%s1014_s3 + $0x18] sm:$0xff]  ;;  %v857_v57 = vld [vmem:[%s1014_s3 + $0x28] sm:$0xff]  ;;  %vm467_vm13 = vcmp.ne.s32.totalorder %v809_v39, 4294967196 }
   0x5   :  { %595 = vmatprep.mubr.msk.bf16.mxu0 %vm98_vm0, %v614_v2  ;;  %599 = vmatprep.mubr.msk.bf16.mxu1 %vm98_vm0, %v616_v3  ;;  %29 = vst.msk [vmem:[#allocation2 + $0x30] sm:$0xff] %vm22_vm1, %v666_v6  ;;  %30 = vst.msk [vmem:[#allocation2 + $0x38] sm:$0xff] %vm22_vm1, %v666_v6  ;;  %v875_v61 = vld [vmem:[%s1014_s3 + $0x38] sm:$0xff]  ;;  %v886_v62 = vld [vmem:[%s1014_s3] sm:$0xff]  ;;  %vm469_vm15 = vcmp.ne.s32.totalorder %v833_v48, 4294967196 }
   0x6   :  { %33 = vst.msk [vmem:[#allocation3 + $0x10] sm:$0xff] %vm22_vm1, %v668_v25  ;;  %31 = vst.msk [vmem:[#allocation3] sm:$0xff] %vm22_vm1, %v668_v25  ;;  %v892_v63 = vld [vmem:[%s1014_s3 + $0x10] sm:$0xff]  ;;  %v898_v0 = vld [vmem:[%s1014_s3 + $0x20] sm:$0xff]  ;;  %vm466_vm10 = vcmp.ne.s32.totalorder %v886_v62, 4294967196 }
   0x7   :  { %594 = vmatpush3.bf16.msra.mxu0 %v613_v1  ;;  %606 = vmatpush3.bf16.msra.mxu1 %v613_v1  ;;  %32 = vst.msk [vmem:[#allocation3 + $0x8] sm:$0xff] %vm22_vm1, %v668_v25  ;;  %34 = vst.msk [vmem:[#allocation3 + $0x18] sm:$0xff] %vm22_vm1, %v668_v25  ;;  %v904_v1 = vld [vmem:[%s1014_s3 + $0x30] sm:$0xff]  ;;  %vm468_vm11 = vcmp.ne.s32.totalorder %v892_v63, 4294967196  ;;  %vm470_vm12 = vcmp.ne.s32.totalorder %v898_v0, 4294967196 }
   0x8   :  { %35 = vst.msk [vmem:[#allocation3 + $0x20] sm:$0xff] %vm22_vm1, %v668_v25  ;;  %36 = vst.msk [vmem:[#allocation3 + $0x28] sm:$0xff] %vm22_vm1, %v668_v25  ;;  %v779_v26 = vld [vmem:[#allocation2 + $0x10] sm:$0xff]  ;;  %vm472_vm14 = vcmp.ne.s32.totalorder %v904_v1, 4294967196 }
   0x9   :  { %37 = vst.msk [vmem:[#allocation3 + $0x30] sm:$0xff] %vm22_vm1, %v668_v25  ;;  %38 = vst.msk [vmem:[#allocation3 + $0x38] sm:$0xff] %vm22_vm1, %v668_v25  ;;  %v781_v27 = vld [vmem:[#allocation2] sm:$0xff] }
   0xa   :  { %596 = vmatmul.mubr.msk.bf16.vlgmr.msra.gmra.mrb[0].mxu0 %vm98_vm0, %v615_v4  ;;  %600 = vmatmul.mubr.msk.bf16.vlgmr.msra.gmra.mrb[0].mxu1 %vm98_vm0, %v617_v5  ;;  %39 = vst.msk [vmem:[#allocation4] sm:$0xff] %vm22_vm1, %v668_v25  ;;  %40 = vst.msk [vmem:[#allocation4 + $0x8] sm:$0xff] %vm22_vm1, %v668_v25  ;;  %v789_v32 = vld [vmem:[#allocation2 + $0x18] sm:$0xff]  ;;  %v820_v43 = vld [vmem:[#allocation2 + $0x8] sm:$0xff]  ;;  %vm471_vm0 = vcmp.ne.s32.totalorder %v857_v57, 4294967196 }
   0xb   :  { %41 = vst.msk [vmem:[#allocation4 + $0x10] sm:$0xff] %vm22_vm1, %v668_v25  ;;  %42 = vst.msk [vmem:[#allocation4 + $0x18] sm:$0xff] %vm22_vm1, %v668_v25  ;;  %v796_v34 = vld [vmem:[#allocation2 + $0x20] sm:$0xff]  ;;  %v814_v41 = vld [vmem:[#allocation2 + $0x28] sm:$0xff] }
   0xc   :  { %43 = vst.msk [vmem:[#allocation4 + $0x20] sm:$0xff] %vm22_vm1, %v668_v25  ;;  %44 = vst.msk [vmem:[#allocation4 + $0x28] sm:$0xff] %vm22_vm1, %v668_v25  ;;  %v838_v50 = vld [vmem:[#allocation2 + $0x38] sm:$0xff]  ;;  %v844_v52 = vld [vmem:[#allocation2 + $0x30] sm:$0xff] }
   0xd   :  { %45 = vst.msk [vmem:[#allocation4 + $0x30] sm:$0xff] %vm22_vm1, %v668_v25  ;;  %46 = vst.msk [vmem:[#allocation4 + $0x38] sm:$0xff] %vm22_vm1, %v668_v25 }
  0xdd   :  { %v597_v8 = vpop.f32.mrb[0].mxu0  ;;  %v601_v9 = vpop.f32.mrb[0].mxu1 }
  0xde   :  { %v723_v10 = vadd.f32 %v597_v8, %v566_v7  ;;  %v145_v11 = vpop.f32.mrb[1].mxu0  ;;  %v161_v12 = vpop.f32.mrb[1].mxu1  ;;  %v743_v23 = vadd.f32 %v601_v9, %v566_v7 }
  0xdf   :  { %v725_v13 = vadd.f32 %v566_v7, %v145_v11  ;;  %v598_v14 = vpop.f32.mrb[2].mxu0  ;;  %v602_v15 = vpop.f32.mrb[2].mxu1  ;;  %v728_v18 = vadd.f32 %v566_v7, %v161_v12 }
  0xe0   :  { %202 = vmax.xlane.f32.xlu1 %v723_v10  ;;  %v148_v16 = vpop.f32.mrb[3].mxu0  ;;  %v164_v17 = vpop.f32.mrb[3].mxu1  ;;  %v731_v19 = vadd.f32 %v598_v14, %v566_v7  ;;  %v741_v22 = vadd.f32 %v602_v15, %v566_v7 }
  0xe1   :  { %198 = vmax.xlane.f32.xlu0 %v725_v13  ;;  %v735_v20 = vadd.f32 %v566_v7, %v164_v17  ;;  %v737_v21 = vadd.f32 %v566_v7, %v148_v16 }
  0xe4   :  { %204 = vmax.xlane.f32.xlu1 %v731_v19 }
  0xe5   :  { %206 = vmax.xlane.f32.xlu0 %v728_v18 }
  0xe8   :  { %208 = vmax.xlane.f32.xlu1 %v735_v20 }
  0xe9   :  { %200 = vmax.xlane.f32.xlu0 %v737_v21 }
  0xec   :  { %212 = vmax.xlane.f32.xlu1 %v741_v22 }
  0xed   :  { %210 = vmax.xlane.f32.xlu0 %v743_v23 }
 0x16d   :  { %v203_v28 = vpop.xlane.xlu1 %202 }
 0x16e   :  { %v784_v29 = vmax.f32 %v779_v26, %v203_v28  ;;  %v199_v30 = vpop.xlane.xlu0 %198 }
 0x16f   :  { %v787_v31 = vmax.f32 %v781_v27, %v199_v30 }
 0x170   :  { %v232_v33 = vsub.f32 %v779_v26, %v784_v29  ;;  %449 = vst.msk [vmem:[#allocation2 + $0x10] sm:$0xff] %vm22_vm1, %v784_v29  ;;  %274 = vperm.xlu1 %611, %v784_v29  }
 0x171   :  { %v230_v35 = vsub.f32 %v781_v27, %v787_v31  ;;  %447 = vst.msk [vmem:[#allocation2] sm:$0xff] %vm22_vm1, %v787_v31  ;;  %v205_v36 = vpop.xlane.xlu1 %204  ;;  %264 = vperm.xlu0 %610, %v787_v31  }
 0x172   :  { %v804_v37 = vmax.f32 %v789_v32, %v205_v36  ;;  %v207_v38 = vpop.xlane.xlu0 %206 }
 0x173   :  { %v812_v40 = vmax.f32 %v796_v34, %v207_v38 }
 0x174   :  { %v233_v42 = vsub.f32 %v789_v32, %v804_v37  ;;  %450 = vst.msk [vmem:[#allocation2 + $0x18] sm:$0xff] %vm22_vm1, %v804_v37 }
 0x175   :  { %v234_v44 = vsub.f32 %v796_v34, %v812_v40  ;;  %451 = vst.msk [vmem:[#allocation2 + $0x20] sm:$0xff] %vm22_vm1, %v812_v40  ;;  %v209_v45 = vpop.xlane.xlu1 %208  ;;  %379 = vperm.xlu0 %610, %v809_v39  }
 0x176   :  { %v828_v46 = vmax.f32 %v814_v41, %v209_v45  ;;  %v201_v47 = vpop.xlane.xlu0 %200 }
 0x177   :  { %v836_v49 = vmax.f32 %v820_v43, %v201_v47 }
 0x178   :  { %v235_v51 = vsub.f32 %v814_v41, %v828_v46  ;;  %452 = vst.msk [vmem:[#allocation2 + $0x28] sm:$0xff] %vm22_vm1, %v828_v46  ;;  %v359_v41 = vld [vmem:[#allocation4] sm:$0xff] }
 0x179   :  { %v231_v53 = vsub.f32 %v820_v43, %v836_v49  ;;  %448 = vst.msk [vmem:[#allocation2 + $0x8] sm:$0xff] %vm22_vm1, %v836_v49  ;;  %v213_v54 = vpop.xlane.xlu1 %212  ;;  %385 = vperm.xlu0 %610, %v833_v48  }
 0x17a   :  { %v852_v55 = vmax.f32 %v838_v50, %v213_v54  ;;  %v211_v56 = vpop.xlane.xlu0 %210 }
 0x17b   :  { %v860_v58 = vmax.f32 %v844_v52, %v211_v56  ;;  %v240_v34 = vmul.f32 1.442695, %v231_v53  ;;  %v248_v53 = vmul.f32 1.442695, %v235_v51 }
 0x17c   :  { %v237_v59 = vsub.f32 %v838_v50, %v852_v55  ;;  %454 = vst.msk [vmem:[#allocation2 + $0x38] sm:$0xff] %vm22_vm1, %v852_v55 }
 0x17d   :  { %v236_v60 = vsub.f32 %v844_v52, %v860_v58  ;;  %453 = vst.msk [vmem:[#allocation2 + $0x30] sm:$0xff] %vm22_vm1, %v860_v58  ;;  %391 = vperm.xlu0 %610, %v857_v57   ;;  %294 = vperm.xlu1 %611, %v860_v58   ;;  %v244_v52 = vmul.f32 1.442695, %v233_v42 }
 0x17e   :  { %v252_v32 = vmul.f32 1.442695, %v237_v59 }
 0x181   :  { %397 = vperm.xlu0 %610, %v875_v61   ;;  %284 = vperm.xlu1 %611, %v812_v40  }
 0x185   :  { %279 = vperm.xlu1 %611, %v804_v37  }
 0x189   :  { %269 = vperm.xlu1 %611, %v836_v49  }
 0x18d   :  { %289 = vperm.xlu1 %611, %v828_v46  }
 0x191   :  { %299 = vperm.xlu1 %611, %v852_v55   ;;  %v223_v55 = vld [vmem:[#allocation3 + $0x8] sm:$0xff] }
 0x195   :  { %376 = vperm.xlu1 %611, %v886_v62   ;;  %v492_v62 = vld [vmem:[#allocation2 + $0x10] sm:$0xff] }
 0x199   :  { %382 = vperm.xlu1 %611, %v892_v63  }
 0x19d   :  { %388 = vperm.xlu1 %611, %v898_v0   ;;  %v491_v0 = vld [vmem:[#allocation2 + $0x8] sm:$0xff] }
 0x1a1   :  { %394 = vperm.xlu1 %611, %v904_v1  }
 0x1ef   :  { %v275_v2 = vpop.permute.xlu1 %274 }
 0x1f0   :  { %v304_v3 = vsub.f32 %v723_v10, %v275_v2  ;;  %v265_v4 = vpop.permute.xlu0 %264 }
 0x1f1   :  { %v302_v5 = vsub.f32 %v725_v13, %v265_v4 }
 0x1f2   :  { %v314_v6 = vmul.f32 1.442695, %v304_v3 }
 0x1f3   :  { %v310_v7 = vmul.f32 1.442695, %v302_v5  ;;  %v177_v5 = vlaneseq }
 0x1f4   :  { %618 = vpow2.f32 %v314_v6 }
 0x1f5   :  { %620 = vpow2.f32 %v310_v7 }
 0x1fc   :  { %v295_v8 = vpop.permute.xlu1 %294 }
 0x1fd   :  { %v308_v9 = vsub.f32 %v743_v23, %v295_v8 }
 0x1fe   :  { %v619_v11 = vpop.eup %618 }
 0x1ff   :  { %v621_v12 = vpop.eup %620  ;;  %v322_v14 = vmul.f32 1.442695, %v308_v9  ;;  %330 = vadd.xlane.f32.xlu0 %v619_v11  ;;  %v178_v11 = vand.u32 127, %v177_v5  ;;  %v222_v5 = vld [vmem:[#allocation3] sm:$0xff] }
 0x200   :  { %v285_v15 = vpop.permute.xlu1 %284  ;;  %326 = vadd.xlane.f32.xlu1 %v621_v12 }
 0x201   :  { %622 = vpow2.f32 %v322_v14  ;;  %v306_v16 = vsub.f32 %v728_v18, %v285_v15  ;;  %v380_v15 = vpop.permute.xlu0 %379 }
 0x202   :  { %vm400_vm5 = vcmp.eq.s32.totalorder %v178_v11, %v380_v15 }
 0x203   :  { %v318_v17 = vmul.f32 1.442695, %v306_v16 }
 0x204   :  { %v280_v24 = vpop.permute.xlu1 %279 }
 0x205   :  { %624 = vpow2.f32 %v318_v17  ;;  %v305_v28 = vsub.f32 %v731_v19, %v280_v24 }
 0x207   :  { %v316_v30 = vmul.f32 1.442695, %v305_v28 }
 0x208   :  { %v270_v36 = vpop.permute.xlu1 %269 }
 0x209   :  { %626 = vpow2.f32 %v316_v30  ;;  %v303_v38 = vsub.f32 %v737_v21, %v270_v36  ;;  %v386_v30 = vpop.permute.xlu0 %385 }
 0x20a   :  { %vm402_vm7 = vcmp.eq.s32.totalorder %v178_v11, %v386_v30  ;;  %v229_v30 = vld [vmem:[#allocation3 + $0x38] sm:$0xff] }
 0x20b   :  { %v623_v45 = vpop.eup %622  ;;  %v312_v47 = vmul.f32 1.442695, %v303_v38 }
 0x20c   :  { %338 = vadd.xlane.f32.xlu0 %v623_v45  ;;  %v290_v54 = vpop.permute.xlu1 %289 }
 0x20d   :  { %628 = vpow2.f32 %v312_v47  ;;  %v307_v3 = vsub.f32 %v735_v20, %v290_v54  ;;  %v392_v47 = vpop.permute.xlu0 %391  ;;  %v408_v54 = vsel %vm400_vm5, %v737_v21, 0.0  ;;  %v238_v21 = vmul.f32 1.442695, %v230_v35 }
 0x20e   :  { %vm404_vm8 = vcmp.eq.s32.totalorder %v178_v11, %v392_v47  ;;  %v361_v47 = vld [vmem:[#allocation4 + $0x10] sm:$0xff] }
 0x20f   :  { %v625_v56 = vpop.eup %624  ;;  %v320_v9 = vmul.f32 1.442695, %v307_v3  ;;  %v224_v3 = vld [vmem:[#allocation3 + $0x10] sm:$0xff] }
 0x210   :  { %334 = vadd.xlane.f32.xlu0 %v625_v56  ;;  %v300_v2 = vpop.permute.xlu1 %299 }
 0x211   :  { %v309_v4 = vsub.f32 %v741_v22, %v300_v2  ;;  %v398_v56 = vpop.permute.xlu0 %397  ;;  %v412_v2 = vsel %vm404_vm8, %v735_v20, 0.0 }
 0x212   :  { %vm406_vm9 = vcmp.eq.s32.totalorder %v178_v11, %v398_v56 }
 0x213   :  { %v627_v6 = vpop.eup %626  ;;  %v324_v7 = vmul.f32 1.442695, %v309_v4 }
 0x214   :  { %v377_v8 = vpop.permute.xlu1 %376  ;;  %332 = vadd.xlane.f32.xlu1 %v627_v6 }
 0x215   :  { %630 = vpow2.f32 %v324_v7  ;;  %vm399_vm2 = vcmp.eq.s32.totalorder %v178_v11, %v377_v8  ;;  %v226_v7 = vld [vmem:[#allocation3 + $0x20] sm:$0xff] }
 0x216   :  { %632 = vpow2.f32 %v320_v9  ;;  %v407_v16 = vsel %vm399_vm2, %v725_v13, 0.0  ;;  %vm473_vm2 = vcmp.ne.s32.totalorder %v875_v61, 4294967196 }
 0x217   :  { %v629_v12 = vpop.eup %628 }
 0x218   :  { %328 = vadd.xlane.f32.xlu0 %v629_v12  ;;  %v383_v14 = vpop.permute.xlu1 %382 }
 0x219   :  { %vm401_vm3 = vcmp.eq.s32.totalorder %v178_v11, %v383_v14 }
 0x21a   :  { %v409_v28 = vsel %vm401_vm3, %v723_v10, 0.0  ;;  %v410_v10 = vsel %vm402_vm7, %v731_v19, 0.0  ;;  %v250_v19 = vmul.f32 1.442695, %v236_v60 }
 0x21c   :  { %415 = vadd.xlane.f32.xlu0 %v407_v16  ;;  %v389_v17 = vpop.permute.xlu1 %388 }
 0x21d   :  { %vm403_vm4 = vcmp.eq.s32.totalorder %v178_v11, %v389_v17 }
 0x21e   :  { %v411_v45 = vsel %vm403_vm4, %v728_v18, 0.0  ;;  %v414_v18 = vsel %vm406_vm9, %v741_v22, 0.0  ;;  %v246_v22 = vmul.f32 1.442695, %v234_v44  ;;  %v228_v44 = vld [vmem:[#allocation3 + $0x30] sm:$0xff] }
 0x21f   :  { %v631_v24 = vpop.eup %630 }
 0x220   :  { %419 = vadd.xlane.f32.xlu0 %v409_v28  ;;  %340 = vadd.xlane.f32.xlu1 %v631_v24  ;;  %v395_v36 = vpop.permute.xlu1 %394  ;;  %v633_v38 = vpop.eup %632 }
 0x221   :  { %vm405_vm6 = vcmp.eq.s32.totalorder %v178_v11, %v395_v36  ;;  %v225_v11 = vld [vmem:[#allocation3 + $0x18] sm:$0xff] }
 0x222   :  { %v413_v13 = vsel %vm405_vm6, %v743_v23, 0.0  ;;  %v242_v23 = vmul.f32 1.442695, %v232_v33 }
 0x224   :  { %423 = vadd.xlane.f32.xlu0 %v411_v45  ;;  %336 = vadd.xlane.f32.xlu1 %v633_v38  ;;  %634 = vpow2.f32 %v242_v23 }
 0x225   :  { %636 = vpow2.f32 %v238_v21 }
 0x226   :  { %638 = vpow2.f32 %v250_v19 }
 0x227   :  { %640 = vpow2.f32 %v246_v22  ;;  %v490_v22 = vld [vmem:[#allocation2] sm:$0xff] }
 0x228   :  { %427 = vadd.xlane.f32.xlu0 %v413_v13  ;;  %417 = vadd.xlane.f32.xlu1 %v408_v54  ;;  %642 = vpow2.f32 %v244_v52 }
 0x229   :  { %644 = vpow2.f32 %v240_v34  ;;  %v577_v34 = vsel %vm466_vm10, 1.0, %v668_v25 }
 0x22a   :  { %646 = vpow2.f32 %v252_v32 }
 0x22c   :  { %421 = vadd.xlane.f32.xlu1 %v410_v10 }
 0x22e   :  { %v635_v20 = vpop.eup %634 }
 0x22f   :  { %v637_v4 = vpop.eup %636  ;;  %v256_v26 = vmul.f32 %v635_v20, %v224_v3 }
 0x230   :  { %425 = vadd.xlane.f32.xlu1 %v412_v2  ;;  %v254_v33 = vmul.f32 %v637_v4, %v222_v5  ;;  %v639_v40 = vpop.eup %638  ;;  %v227_v2 = vld [vmem:[#allocation3 + $0x28] sm:$0xff]  ;;  %v363_v4 = vld [vmem:[#allocation4 + $0x20] sm:$0xff] }
 0x231   :  { %v260_v58 = vmul.f32 %v639_v40, %v228_v44  ;;  %v641_v60 = vpop.eup %640  ;;  %v360_v44 = vld [vmem:[#allocation4 + $0x8] sm:$0xff] }
 0x232   :  { %v258_v37 = vmul.f32 %v641_v60, %v226_v7  ;;  %v643_v42 = vpop.eup %642 }
 0x233   :  { %v257_v12 = vmul.f32 %v643_v42, %v225_v11  ;;  %v645_v14 = vpop.eup %644 }
 0x234   :  { %429 = vadd.xlane.f32.xlu1 %v414_v18  ;;  %v255_v16 = vmul.f32 %v645_v14, %v223_v55  ;;  %v647_v46 = vpop.eup %646  ;;  %v494_v14 = vld [vmem:[#allocation2 + $0x20] sm:$0xff] }
 0x235   :  { %v261_v13 = vmul.f32 %v647_v46, %v229_v30  ;;  %v364_v30 = vld [vmem:[#allocation4 + $0x28] sm:$0xff] }
 0x28c   :  { %v331_v29 = vpop.xlane.xlu0 %330 }
 0x28d   :  { %v344_v27 = vadd.f32 %v331_v29, %v256_v26  ;;  %v327_v31 = vpop.xlane.xlu1 %326 }
 0x28e   :  { %v342_v35 = vadd.f32 %v327_v31, %v254_v33 }
 0x28f   :  { %353 = vst.msk [vmem:[#allocation3 + $0x10] sm:$0xff] %vm22_vm1, %v344_v27 }
 0x290   :  { %351 = vst.msk [vmem:[#allocation3] sm:$0xff] %vm22_vm1, %v342_v35 }
 0x296   :  { %v500_v15 = vld [vmem:[#allocation3 + $0x10] sm:$0xff] }
 0x297   :  { %v498_v43 = vld [vmem:[#allocation3] sm:$0xff] }
 0x298   :  { %648 = vlog2.f32 %v498_v43 }
 0x299   :  { %v339_v6 = vpop.xlane.xlu0 %338  ;;  %650 = vpow2.f32 %v248_v53 }
 0x29a   :  { %v348_v8 = vadd.f32 %v339_v6, %v260_v58  ;;  %652 = vlog2.f32 %v500_v15  ;;  %v365_v58 = vld [vmem:[#allocation4 + $0x30] sm:$0xff] }
 0x29c   :  { %357 = vst.msk [vmem:[#allocation3 + $0x30] sm:$0xff] %vm22_vm1, %v348_v8 }
 0x29d   :  { %v335_v9 = vpop.xlane.xlu0 %334 }
 0x29e   :  { %v346_v49 = vadd.f32 %v335_v9, %v258_v37 }
 0x2a0   :  { %355 = vst.msk [vmem:[#allocation3 + $0x20] sm:$0xff] %vm22_vm1, %v346_v49  ;;  %v579_v49 = vsel %vm468_vm11, 1.0, %v668_v25 }
 0x2a1   :  { %v333_v50 = vpop.xlane.xlu1 %332 }
 0x2a2   :  { %v345_v59 = vadd.f32 %v333_v50, %v257_v12  ;;  %v649_v45 = vpop.eup %648  ;;  %v362_v12 = vld [vmem:[#allocation4 + $0x18] sm:$0xff] }
 0x2a3   :  { %v504_v36 = vld [vmem:[#allocation3 + $0x30] sm:$0xff]  ;;  %v651_v54 = vpop.eup %650  ;;  %v507_v21 = vmul.f32 0.6931472, %v649_v45 }
 0x2a4   :  { %354 = vst.msk [vmem:[#allocation3 + $0x18] sm:$0xff] %vm22_vm1, %v345_v59  ;;  %v653_v18 = vpop.eup %652  ;;  %v259_v5 = vmul.f32 %v651_v54, %v227_v2  ;;  %v578_v2 = vsel %vm467_vm13, 1.0, %v668_v25 }
 0x2a5   :  { %v329_v17 = vpop.xlane.xlu0 %328  ;;  %v511_v26 = vmul.f32 0.6931472, %v653_v18  ;;  %v522_v27 = vadd.f32 %v507_v21, %v490_v22 }
 0x2a6   :  { %v343_v24 = vadd.f32 %v329_v17, %v255_v16 }
 0x2a7   :  { %v502_v28 = vld [vmem:[#allocation3 + $0x20] sm:$0xff]  ;;  %v524_v6 = vadd.f32 %v511_v26, %v492_v62  ;;  %v582_v62 = vsel %vm471_vm0, 1.0, %v668_v25 }
 0x2a8   :  { %352 = vst.msk [vmem:[#allocation3 + $0x8] sm:$0xff] %vm22_vm1, %v343_v24  ;;  %654 = vlog2.f32 %v502_v28 }
 0x2a9   :  { %v416_v51 = vpop.xlane.xlu0 %415  ;;  %656 = vlog2.f32 %v504_v36 }
 0x2aa   :  { %v431_v38 = vadd.f32 %v416_v51, %v359_v41  ;;  %v581_v41 = vsel %vm470_vm12, 1.0, %v668_v25 }
 0x2ab   :  { %v501_v23 = vld [vmem:[#allocation3 + $0x18] sm:$0xff] }
 0x2ac   :  { %439 = vst.msk [vmem:[#allocation4] sm:$0xff] %vm22_vm1, %v431_v38  ;;  %v496_v38 = vld [vmem:[#allocation2 + $0x30] sm:$0xff] }
 0x2ad   :  { %v341_v10 = vpop.xlane.xlu1 %340  ;;  %v420_v56 = vpop.xlane.xlu0 %419 }
 0x2ae   :  { %v349_v19 = vadd.f32 %v341_v10, %v261_v13  ;;  %v433_v20 = vadd.f32 %v420_v56, %v361_v47 }
 0x2af   :  { %v499_v3 = vld [vmem:[#allocation3 + $0x8] sm:$0xff] }
 0x2b0   :  { %658 = vlog2.f32 %v499_v3  ;;  %358 = vst.msk [vmem:[#allocation3 + $0x38] sm:$0xff] %vm22_vm1, %v349_v19  ;;  %441 = vst.msk [vmem:[#allocation4 + $0x10] sm:$0xff] %vm22_vm1, %v433_v20  ;;  %v366_v19 = vld [vmem:[#allocation4 + $0x38] sm:$0xff] }
 0x2b1   :  { %660 = vlog2.f32 %v501_v23  ;;  %v337_v29 = vpop.xlane.xlu1 %336  ;;  %v424_v33 = vpop.xlane.xlu0 %423  ;;  %v583_v23 = vsel %vm472_vm14, 1.0, %v668_v25  ;;  %v493_v20 = vld [vmem:[#allocation2 + $0x18] sm:$0xff] }
 0x2b2   :  { %v347_v31 = vadd.f32 %v337_v29, %v259_v5  ;;  %v435_v35 = vadd.f32 %v424_v33, %v363_v4  ;;  %v655_v52 = vpop.eup %654  ;;  %v580_v33 = vsel %vm469_vm15, 1.0, %v668_v25 }
 0x2b3   :  { %v530_v40 = vld [vmem:[#allocation4] sm:$0xff]  ;;  %v515_v37 = vmul.f32 0.6931472, %v655_v52  ;;  %v657_v11 = vpop.eup %656 }
 0x2b4   :  { %v538_v60 = vsub.f32 %v522_v27, %v530_v40  ;;  %356 = vst.msk [vmem:[#allocation3 + $0x28] sm:$0xff] %vm22_vm1, %v347_v31  ;;  %443 = vst.msk [vmem:[#allocation4 + $0x20] sm:$0xff] %vm22_vm1, %v435_v35  ;;  %v519_v16 = vmul.f32 0.6931472, %v657_v11  ;;  %v495_v40 = vld [vmem:[#allocation2 + $0x28] sm:$0xff] }
 0x2b5   :  { %v418_v7 = vpop.xlane.xlu1 %417  ;;  %v428_v8 = vpop.xlane.xlu0 %427  ;;  %v526_v59 = vadd.f32 %v515_v37, %v494_v14 }
 0x2b6   :  { %v546_v32 = vmul.f32 %v577_v34, %v538_v60  ;;  %v432_v42 = vadd.f32 %v418_v7, %v360_v44  ;;  %v437_v9 = vadd.f32 %v428_v8, %v365_v58  ;;  %v528_v54 = vadd.f32 %v519_v16, %v496_v38  ;;  %v497_v44 = vld [vmem:[#allocation2 + $0x38] sm:$0xff] }
 0x2b7   :  { %v505_v43 = vld [vmem:[#allocation3 + $0x38] sm:$0xff]  ;;  %v532_v53 = vld [vmem:[#allocation4 + $0x10] sm:$0xff]  ;;  %v584_v8 = vsel %vm473_vm2, 1.0, %v668_v25 }
 0x2b8   :  { %554 = vst.msk [vmem:[%s1015_s4] sm:$0xff] %vm22_vm1, %v546_v32  ;;  %v540_v63 = vsub.f32 %v524_v6, %v532_v53  ;;  %440 = vst.msk [vmem:[#allocation4 + $0x8] sm:$0xff] %vm22_vm1, %v432_v42  ;;  %662 = vlog2.f32 %v505_v43 }
 0x2b9   :  { %445 = vst.msk [vmem:[#allocation4 + $0x30] sm:$0xff] %vm22_vm1, %v437_v9  ;;  %v422_v15 = vpop.xlane.xlu1 %421 }
 0x2ba   :  { %v659_v50 = vpop.eup %658  ;;  %v548_v55 = vmul.f32 %v579_v49, %v540_v63  ;;  %v434_v17 = vadd.f32 %v422_v15, %v362_v12 }
 0x2bb   :  { %v661_v24 = vpop.eup %660  ;;  %v503_v28 = vld [vmem:[#allocation3 + $0x28] sm:$0xff]  ;;  %v534_v46 = vld [vmem:[#allocation4 + $0x20] sm:$0xff]  ;;  %v509_v51 = vmul.f32 0.6931472, %v659_v50 }
 0x2bc   :  { %556 = vst.msk [vmem:[%s1015_s4 + $0x10] sm:$0xff] %vm22_vm1, %v548_v55  ;;  %664 = vlog2.f32 %v503_v28  ;;  %v542_v36 = vsub.f32 %v526_v59, %v534_v46  ;;  %442 = vst.msk [vmem:[#allocation4 + $0x18] sm:$0xff] %vm22_vm1, %v434_v17  ;;  %v513_v10 = vmul.f32 0.6931472, %v661_v24 }
 0x2bd   :  { %v523_v45 = vadd.f32 %v509_v51, %v491_v0  ;;  %v426_v47 = vpop.xlane.xlu1 %425 }
 0x2be   :  { %v550_v13 = vmul.f32 %v581_v41, %v542_v36  ;;  %v436_v56 = vadd.f32 %v426_v47, %v364_v30  ;;  %v525_v22 = vadd.f32 %v513_v10, %v493_v20 }
 0x2bf   :  { %v531_v18 = vld [vmem:[#allocation4 + $0x8] sm:$0xff] }
 0x2c0   :  { %v536_v21 = vld [vmem:[#allocation4 + $0x30] sm:$0xff]  ;;  %558 = vst.msk [vmem:[%s1015_s4 + $0x20] sm:$0xff] %vm22_vm1, %v550_v13  ;;  %v539_v39 = vsub.f32 %v523_v45, %v531_v18  ;;  %444 = vst.msk [vmem:[#allocation4 + $0x28] sm:$0xff] %vm22_vm1, %v436_v56 }
 0x2c1   :  { %v544_v1 = vsub.f32 %v528_v54, %v536_v21  ;;  %v430_v3 = vpop.xlane.xlu1 %429 }
 0x2c2   :  { %v547_v4 = vmul.f32 %v578_v2, %v539_v39  ;;  %v438_v26 = vadd.f32 %v430_v3, %v366_v19  ;;  %v663_v29 = vpop.eup %662 }
 0x2c3   :  { %v552_v5 = vmul.f32 %v583_v23, %v544_v1  ;;  %v533_v27 = vld [vmem:[#allocation4 + $0x18] sm:$0xff]  ;;  %v521_v52 = vmul.f32 0.6931472, %v663_v29 }
 0x2c4   :  { %555 = vst.msk [vmem:[%s1015_s4 + $0x8] sm:$0xff] %vm22_vm1, %v547_v4  ;;  %v541_v48 = vsub.f32 %v525_v22, %v533_v27  ;;  %446 = vst.msk [vmem:[#allocation4 + $0x38] sm:$0xff] %vm22_vm1, %v438_v26 }
 0x2c5   :  { %560 = vst.msk [vmem:[%s1015_s4 + $0x30] sm:$0xff] %vm22_vm1, %v552_v5  ;;  %v529_v6 = vadd.f32 %v521_v52, %v497_v44 }
 0x2c6   :  { %v665_v31 = vpop.eup %664  ;;  %v549_v35 = vmul.f32 %v580_v33, %v541_v48 }
 0x2c7   :  { %v517_v34 = vmul.f32 0.6931472, %v665_v31  ;;  %v535_v60 = vld [vmem:[#allocation4 + $0x28] sm:$0xff] }
 0x2c8   :  { %557 = vst.msk [vmem:[%s1015_s4 + $0x18] sm:$0xff] %vm22_vm1, %v549_v35 }
 0x2c9   :  { %v527_v58 = vadd.f32 %v517_v34, %v495_v40 }
 0x2cb   :  { %v543_v7 = vsub.f32 %v527_v58, %v535_v60  ;;  %v537_v32 = vld [vmem:[#allocation4 + $0x38] sm:$0xff] }
 0x2cc   :  { %v545_v57 = vsub.f32 %v529_v6, %v537_v32 }
 0x2cd   :  { %v551_v37 = vmul.f32 %v582_v62, %v543_v7 }
 0x2ce   :  { %v553_v42 = vmul.f32 %v584_v8, %v545_v57 }
 0x2cf   :  { %559 = vst.msk [vmem:[%s1015_s4 + $0x28] sm:$0xff] %vm22_vm1, %v551_v37 }
 0x2d0   :  { %561 = vst.msk [vmem:[%s1015_s4 + $0x38] sm:$0xff] %vm22_vm1, %v553_v42 }

</bundles_post_ra>
